<compile_context>
chip_gen: v7x
topology: tpu7x:2x2x1
jax: 0.10.0
libtpu: 0.0.40
codegen_flags: <defaults>
</compile_context>

<pallas_src>
import functools
import numpy as np
import jax
import jax.numpy as jnp
from jax.experimental import pallas as pl
from jax.experimental.pallas import tpu as pltpu

EDGE_DIM = 4
ROW_TILE = 256  # row tile for linear / MLP kernels (multiple of 8)

_PARALLEL = pltpu.CompilerParams(dimension_semantics=("parallel",))
_ARBITRARY = pltpu.CompilerParams(dimension_semantics=("arbitrary",))
_PAR_ARB = pltpu.CompilerParams(dimension_semantics=("parallel", "arbitrary"))


def _row_tile(m, tile=ROW_TILE):
    # full block for small M (always legal), otherwise an 8-aligned tile
    return m if m <= tile else tile


def _attn_row_tile(n):
    # Size the (tm, n) f32 adj tile so its double-buffer stays <= ~8 MiB: fits
    # v5e's 16 MiB / v6e-v7x's 32 MiB default scoped VMEM (and v7x's 64 MiB
    # physical) with room for the resident x / x^T / h scratch.
    if n <= 512:
        return n
    tm = (1 << 20) // n
    return max(8, min(512, (tm // 8) * 8))


# ----------------------------- Pallas kernels -----------------------------

def _linear_kernel(x_ref, w_ref, b_ref, o_ref, *, relu):
    y = jnp.dot(x_ref[...], w_ref[...], preferred_element_type=jnp.float32) + b_ref[...]
    if relu:
        y = jnp.maximum(y, 0.0)
    o_ref[...] = y


def pallas_linear(x, w, b, relu=False):
    """y = x @ w + b (optional fused ReLU), row-tiled over M, f32 throughout."""
    x = jnp.asarray(x, jnp.float32)
    M, K = x.shape
    N = w.shape[1]
    tm = _row_tile(M)
    return pl.pallas_call(
        functools.partial(_linear_kernel, relu=relu),
        out_shape=jax.ShapeDtypeStruct((M, N), jnp.float32),
        grid=(pl.cdiv(M, tm),),
        in_specs=[pl.BlockSpec((tm, K), lambda i: (i, 0)),
                  pl.BlockSpec((K, N), lambda i: (0, 0)),
                  pl.BlockSpec((1, N), lambda i: (0, 0))],
        out_specs=pl.BlockSpec((tm, N), lambda i: (i, 0)),
        compiler_params=_PARALLEL,
    )(x, jnp.asarray(w, jnp.float32), jnp.asarray(b, jnp.float32).reshape(1, N))


def _linear2_kernel(x1_ref, x2_ref, wa_ref, wb_ref, b_ref, o_ref, *, relu):
    # fused [x1 | x2] @ W + b  ==  x1 @ Wa + x2 @ Wb + b  (no concat in HBM)
    y = (jnp.dot(x1_ref[...], wa_ref[...], preferred_element_type=jnp.float32)
         + jnp.dot(x2_ref[...], wb_ref[...], preferred_element_type=jnp.float32)
         + b_ref[...])
    if relu:
        y = jnp.maximum(y, 0.0)
    o_ref[...] = y


def pallas_linear2(x1, x2, wa, wb, b, relu=True):
    x1 = jnp.asarray(x1, jnp.float32)
    x2 = jnp.asarray(x2, jnp.float32)
    M, K1 = x1.shape
    K2 = x2.shape[1]
    N = wa.shape[1]
    tm = _row_tile(M)
    return pl.pallas_call(
        functools.partial(_linear2_kernel, relu=relu),
        out_shape=jax.ShapeDtypeStruct((M, N), jnp.float32),
        grid=(pl.cdiv(M, tm),),
        in_specs=[pl.BlockSpec((tm, K1), lambda i: (i, 0)),
                  pl.BlockSpec((tm, K2), lambda i: (i, 0)),
                  pl.BlockSpec((K1, N), lambda i: (0, 0)),
                  pl.BlockSpec((K2, N), lambda i: (0, 0)),
                  pl.BlockSpec((1, N), lambda i: (0, 0))],
        out_specs=pl.BlockSpec((tm, N), lambda i: (i, 0)),
        compiler_params=_PARALLEL,
    )(x1, x2, wa, wb, jnp.asarray(b, jnp.float32).reshape(1, N))


def _mlp3_2in_kernel(x1_ref, x2_ref, w1a_ref, w1b_ref, b1_ref,
                     w2_ref, b2_ref, w3_ref, b3_ref, o_ref):
    h = (jnp.dot(x1_ref[...], w1a_ref[...], preferred_element_type=jnp.float32)
         + jnp.dot(x2_ref[...], w1b_ref[...], preferred_element_type=jnp.float32)
         + b1_ref[...])
    h = jnp.maximum(h, 0.0)
    h = jnp.maximum(jnp.dot(h, w2_ref[...], preferred_element_type=jnp.float32)
                    + b2_ref[...], 0.0)
    h = jnp.maximum(jnp.dot(h, w3_ref[...], preferred_element_type=jnp.float32)
                    + b3_ref[...], 0.0)
    o_ref[...] = h


def pallas_mlp3_2in(x1, x2, w1a, w1b, b1, w2, b2, w3, b3):
    """Fused 3-layer Linear+ReLU MLP over a fused concat of two inputs."""
    x1 = jnp.asarray(x1, jnp.float32)
    x2 = jnp.asarray(x2, jnp.float32)
    M, K1 = x1.shape
    K2 = x2.shape[1]
    d1, d2, d3 = w1a.shape[1], w2.shape[1], w3.shape[1]
    tm = _row_tile(M)
    return pl.pallas_call(
        _mlp3_2in_kernel,
        out_shape=jax.ShapeDtypeStruct((M, d3), jnp.float32),
        grid=(pl.cdiv(M, tm),),
        in_specs=[pl.BlockSpec((tm, K1), lambda i: (i, 0)),
                  pl.BlockSpec((tm, K2), lambda i: (i, 0)),
                  pl.BlockSpec((K1, d1), lambda i: (0, 0)),
                  pl.BlockSpec((K2, d1), lambda i: (0, 0)),
                  pl.BlockSpec((1, d1), lambda i: (0, 0)),
                  pl.BlockSpec((d1, d2), lambda i: (0, 0)),
                  pl.BlockSpec((1, d2), lambda i: (0, 0)),
                  pl.BlockSpec((d2, d3), lambda i: (0, 0)),
                  pl.BlockSpec((1, d3), lambda i: (0, 0))],
        out_specs=pl.BlockSpec((tm, d3), lambda i: (i, 0)),
        compiler_params=_PARALLEL,
    )(x1, x2, w1a, w1b, b1.reshape(1, d1), w2, b2.reshape(1, d2), w3, b3.reshape(1, d3))


def _gat_attn_kernel(xf_ref, xT_ref, xt_ref, w_ref, b_ref, wa_ref, ca_ref, adj_ref,
                     o_ref, h_sc):
    # Projection h = x @ W + b: computed ONCE (first grid step) into a VMEM
    # scratch and reused by every dst-row tile (grid axis is "arbitrary" for
    # this reason; on v7x this trades megacore row-sharding for no-recompute,
    # acceptable since the kernel is HBM-bound on the (tm, N) adj stream).
    @pl.when(pl.program_id(0) == 0)
    def _():
        h_sc[...] = (jnp.dot(xf_ref[...], w_ref[...],
                             preferred_element_type=jnp.float32) + b_ref[...])

    # Rank-1 attention terms folded in-kernel (no extra [N,N] materialization):
    #   score[d, s] = adj[d, s] + (x[d] @ w_dst + c_dst) + (x[s] @ w_src + c_src)
    s_src = (jnp.dot(wa_ref[0:1, :], xT_ref[...],
                     preferred_element_type=jnp.float32) + ca_ref[0:1, 0:1])   # (1, N)
    s_dst = (jnp.sum(xt_ref[...] * wa_ref[1:2, :], axis=-1, keepdims=True)
             + ca_ref[0:1, 1:2])                                               # (tm, 1)
    sc = adj_ref[...] + s_dst + s_src
    sc = jnp.where(sc > 0, sc, 0.2 * sc)                  # leaky_relu(0.2)
    m = jnp.max(sc, axis=-1, keepdims=True)
    p = jnp.exp(sc - m)
    alpha = p / jnp.sum(p, axis=-1, keepdims=True)        # exact f32 softmax
    o_ref[...] = jnp.dot(alpha, h_sc[...], preferred_element_type=jnp.float32)


def fused_gat_attention(x, w, b, w_att, c_att, adj):
    """Fused projection + rank-1 scores + leaky-relu + row-softmax + alpha @ H."""
    x = jnp.asarray(x, jnp.float32)
    N, C = x.shape
    OUT = w.shape[1]
    tm = _attn_row_tile(N)
    return pl.pallas_call(
        _gat_attn_kernel,
        out_shape=jax.ShapeDtypeStruct((N, OUT), jnp.float32),
        grid=(pl.cdiv(N, tm),),
        in_specs=[pl.BlockSpec((N, C), lambda i: (0, 0)),     # x (full, resident)
                  pl.BlockSpec((C, N), lambda i: (0, 0)),     # x^T (full, resident)
                  pl.BlockSpec((tm, C), lambda i: (i, 0)),    # x rows of this dst tile
                  pl.BlockSpec((C, OUT), lambda i: (0, 0)),   # W
                  pl.BlockSpec((1, OUT), lambda i: (0, 0)),   # b
                  pl.BlockSpec((2, C), lambda i: (0, 0)),     # [w_src ; w_dst]
                  pl.BlockSpec((1, 2), lambda i: (0, 0)),     # [c_src , c_dst]
                  pl.BlockSpec((tm, N), lambda i: (i, 0))],   # adj tile (edge term / -1e9)
        out_specs=pl.BlockSpec((tm, OUT), lambda i: (i, 0)),
        scratch_shapes=[pltpu.VMEM((N, OUT), jnp.float32)],
        compiler_params=_ARBITRARY,
    )(x, x.T, x, jnp.asarray(w, jnp.float32),
      jnp.asarray(b, jnp.float32).reshape(1, OUT), w_att, c_att,
      jnp.asarray(adj, jnp.float32))


def _callee_combine_kernel(callee_ref, tmsg_ref, mask_ref,
                           w1a_ref, w1b_ref, b1_ref, w2_ref, b2_ref, w3_ref, b3_ref,
                           o_ref, *, n_callee):
    c = pl.program_id(1)

    @pl.when(c == 0)
    def _():
        o_ref[...] = jnp.zeros_like(o_ref)

    tmsg = tmsg_ref[...]                                            # (tm, 16)
    # fused concat-free first layer: [callee | tmsg] @ W1 = callee@W1a + tmsg@W1b
    h = (jnp.dot(callee_ref[0], w1a_ref[...], preferred_element_type=jnp.float32)
         + jnp.dot(tmsg, w1b_ref[...], preferred_element_type=jnp.float32)
         + b1_ref[...])
    h = jnp.maximum(h, 0.0)
    h = jnp.maximum(jnp.dot(h, w2_ref[...], preferred_element_type=jnp.float32)
                    + b2_ref[...], 0.0)
    h = jnp.maximum(jnp.dot(h, w3_ref[...], preferred_element_type=jnp.float32)
                    + b3_ref[...], 0.0)
    m = mask_ref[0]                                                 # (tm, 1)
    o_ref[...] += jnp.where(m > 0.5, h, tmsg)

    @pl.when(c == n_callee - 1)
    def _():
        o_ref[...] = o_ref[...] * (1.0 / n_callee)


def pallas_callee_combine(callee_x, target_msg, callee_mask,
                          w1a, w1b, b1, w2, b2, w3, b3):
    """Fused per-callee MLP + mask-select + mean over callees.

    Matches: sum_c where(mask[c], gatCallee([callee[c] | tmsg]), tmsg) / C
    with the output block used as the accumulator (reduction axis last).
    """
    callee_x = jnp.asarray(callee_x, jnp.float32)
    target_msg = jnp.asarray(target_msg, jnp.float32)
    Cg, F = callee_x.shape
    T, F2 = target_msg.shape
    d1, d2, d3 = w1a.shape[1], w2.shape[1], w3.shape[1]
    tm = _row_tile(T)
    callee3 = callee_x.reshape(Cg, 1, F)
    mask3 = jnp.asarray(callee_mask, jnp.float32).reshape(Cg, T, 1)
    return pl.pallas_call(
        functools.partial(_callee_combine_kernel, n_callee=Cg),
        out_shape=jax.ShapeDtypeStruct((T, d3), jnp.float32),
        grid=(pl.cdiv(T, tm), Cg),
        in_specs=[pl.BlockSpec((1, 1, F), lambda j, c: (c, 0, 0)),   # callee row
                  pl.BlockSpec((tm, F2), lambda j, c: (j, 0)),       # target_msg tile
                  pl.BlockSpec((1, tm, 1), lambda j, c: (c, j, 0)),  # mask tile
                  pl.BlockSpec((F, d1), lambda j, c: (0, 0)),
                  pl.BlockSpec((F2, d1), lambda j, c: (0, 0)),
                  pl.BlockSpec((1, d1), lambda j, c: (0, 0)),
                  pl.BlockSpec((d1, d2), lambda j, c: (0, 0)),
                  pl.BlockSpec((1, d2), lambda j, c: (0, 0)),
                  pl.BlockSpec((d2, d3), lambda j, c: (0, 0)),
                  pl.BlockSpec((1, d3), lambda j, c: (0, 0))],
        out_specs=pl.BlockSpec((tm, d3), lambda j, c: (j, 0)),
        compiler_params=_PAR_ARB,
    )(callee3, target_msg, mask3, w1a, w1b, b1.reshape(1, d1),
      w2, b2.reshape(1, d2), w3, b3.reshape(1, d3))


# ----------------------------- glue ops -----------------------------------

def global_mean_pool(x, batch, size):
    """Segment mean (PyG semantics; empty groups -> 0). Kept as plain XLA:
    at these sizes a pallas_call per pool is pure launch overhead."""
    x = jnp.asarray(x, jnp.float32)
    batch = jnp.asarray(batch, jnp.int32)
    n = int(size)
    sums = jax.ops.segment_sum(x, batch, num_segments=n)
    cnt = jax.ops.segment_sum(jnp.ones((x.shape[0], 1), jnp.float32), batch,
                              num_segments=n)
    return sums / jnp.maximum(cnt, 1.0)


def build_callee_mask(target_calling_mask, target_offset, target_nodes_num,
                      num_callee_graphs):
    """Host-side precompute of the callee->target-node mask (once per batch)."""
    target_offset = np.asarray(target_offset)
    mask = np.zeros((num_callee_graphs, target_nodes_num), dtype=bool)
    node_off = 0
    for t, tcm in enumerate(target_calling_mask):
        for i, callees in enumerate(tcm):
            for callee_id in callees:
                mask[callee_id + int(target_offset[t]), i + node_off] = True
        node_off += len(tcm)
    return jnp.asarray(mask)


# ----------------------------- GAT (see TODO above) ------------------------

class GAT:
    OUT = 16  # surrounding dataflow requires message_passing output dim == 16

    def __init__(self, key, in_channels, hidden_channels, out_channels, heads,
                 edge_dim=EDGE_DIM):
        del hidden_channels, heads  # heads unused (GAT internals undefined in reference)
        k = jax.random.split(key, 6)
        s = 0.1
        self.W = s * jax.random.normal(k[0], (in_channels, self.OUT), jnp.float32)
        self.b = jnp.zeros((self.OUT,), jnp.float32)
        self.a_src = s * jax.random.normal(k[1], (self.OUT,), jnp.float32)
        self.a_dst = s * jax.random.normal(k[2], (self.OUT,), jnp.float32)
        self.a_edge = s * jax.random.normal(k[3], (edge_dim,), jnp.float32)
        self.W_fc = s * jax.random.normal(k[4], (self.OUT, out_channels), jnp.float32)
        self.b_fc = jnp.zeros((out_channels,), jnp.float32)
        # rank-1 attention terms are linear in x: h@a = x@(W@a) + b.a; the
        # folded vectors are consumed in-kernel by fused_gat_attention.
        self.w_att = jnp.stack([self.W @ self.a_src, self.W @ self.a_dst], axis=0)  # (2, C)
        self.c_att = jnp.stack([jnp.dot(self.b, self.a_src),
                                jnp.dot(self.b, self.a_dst)]).reshape(1, 2)

    def message_passing(self, x, edge_index, edge_attr, node_ids):
        del node_ids  # pooling is done separately by global_mean_pool
        x = jnp.asarray(x, jnp.float32)
        N = x.shape[0]
        src = jnp.asarray(edge_index[0], jnp.int32)
        dst = jnp.asarray(edge_index[1], jnp.int32)
        e_term = jnp.asarray(edge_attr, jnp.float32) @ self.a_edge
        # TODO(synk): dense [N,N] adjacency is built by an XLA scatter (per-edge
        #   dynamic scatter has no clean Pallas TPU equivalent); O(E) CSR tiling
        #   is the follow-up for production graph sizes.
        adj = jnp.full((N, N), -1e9, jnp.float32)
        diag = jnp.arange(N)
        adj = adj.at[diag, diag].set(0.0)            # implicit self-loops
        adj = adj.at[dst, src].set(e_term)           # edges (may overwrite diagonal)
        return fused_gat_attention(x, self.W, self.b, self.w_att, self.c_att, adj)

    def fc(self, x):
        return pallas_linear(x, self.W_fc, self.b_fc, relu=False)


# ----------------------------- EGINN ---------------------------------------

class EGINN:
    rep_dim = 0

    def __init__(self, key, in_channels, hidden_channels, out_channels, heads):
        ks = jax.random.split(key, 10)
        s = 0.1
        self.gatIntra = GAT(ks[0], in_channels, hidden_channels, out_channels, heads)
        self.gatInter = GAT(ks[1], 16, hidden_channels, out_channels, heads)
        self.rep_dim = out_channels
        h2 = hidden_channels * 2
        lower_w = s * jax.random.normal(ks[2], (32, 16), jnp.float32)
        self.lower_wa, self.lower_wb = lower_w[:16], lower_w[16:]
        self.lower_b = jnp.zeros((16,), jnp.float32)
        caller_w1 = s * jax.random.normal(ks[3], (32, h2), jnp.float32)
        self.caller_w1a, self.caller_w1b = caller_w1[:16], caller_w1[16:]
        self.caller_b1 = jnp.zeros((h2,), jnp.float32)
        self.caller_w2 = s * jax.random.normal(ks[4], (h2, h2), jnp.float32)
        self.caller_b2 = jnp.zeros((h2,), jnp.float32)
        self.caller_w3 = s * jax.random.normal(ks[5], (h2, 16), jnp.float32)
        self.caller_b3 = jnp.zeros((16,), jnp.float32)
        callee_w1 = s * jax.random.normal(ks[6], (32, h2), jnp.float32)
        self.callee_w1a, self.callee_w1b = callee_w1[:16], callee_w1[16:]
        self.callee_b1 = jnp.zeros((h2,), jnp.float32)
        self.callee_w2 = s * jax.random.normal(ks[7], (h2, h2), jnp.float32)
        self.callee_b2 = jnp.zeros((h2,), jnp.float32)
        self.callee_w3 = s * jax.random.normal(ks[8], (h2, 16), jnp.float32)
        self.callee_b3 = jnp.zeros((16,), jnp.float32)

    # fused [x | x_lower] @ W + b (+ReLU): no concat materialization
    def gatLower(self, x, x_lower):
        return pallas_linear2(x, x_lower, self.lower_wa, self.lower_wb,
                              self.lower_b, relu=True)

    def gatCaller(self, x1, x2):
        return pallas_mlp3_2in(x1, x2, self.caller_w1a, self.caller_w1b, self.caller_b1,
                               self.caller_w2, self.caller_b2,
                               self.caller_w3, self.caller_b3)

    def gatCalleeCombine(self, callee_x, target_msg, callee_mask):
        return pallas_callee_combine(callee_x, target_msg, callee_mask,
                                     self.callee_w1a, self.callee_w1b, self.callee_b1,
                                     self.callee_w2, self.callee_b2,
                                     self.callee_w3, self.callee_b3)

    def forward(self, intra_interval_x, intra_interval_edge_index, intra_interval_edge_attr,
                inter_interval_edge_index, inter_interval_edge_attr,
                intra_interval_node_ids, inter_interval_node_ids,
                offset, target_entry_node, calling_mask, caller_empty_mask,
                callee_mask=None):
        (caller_x, target_x, callee_x) = intra_interval_x
        (caller_ei, target_ei, callee_ei) = intra_interval_edge_index
        (caller_ea, target_ea, callee_ea) = intra_interval_edge_attr
        (caller_iei, target_iei, callee_iei) = inter_interval_edge_index
        (caller_iea, target_iea, callee_iea) = inter_interval_edge_attr
        (caller_nid, target_nid, callee_nid) = intra_interval_node_ids
        (caller_inid, target_inid, callee_inid) = inter_interval_node_ids
        (caller_offset, target_offset) = offset
        (_caller_calling_mask, target_calling_mask) = calling_mask

        target_nodes_num = target_x.shape[0]
        num_target_graphs = target_offset.shape[0]

        if callee_mask is None:
            # fallback (host loop); prefer precomputing via build_callee_mask
            n_callee = (int(np.max(np.asarray(callee_inid))) + 1
                        if callee_x.shape[0] > 0 else 0)
            callee_mask = build_callee_mask(target_calling_mask, np.asarray(target_offset),
                                            target_nodes_num, n_callee)
        num_callee_graphs = callee_mask.shape[0]
        # NOTE: the reference also builds an `all_mask` that is never used; skipped.

        # ---- caller processing ----
        process_caller_flag = caller_x.shape[0] > 0
        if process_caller_flag:
            num_caller_intervals = caller_inid.shape[0]
            num_caller_graphs = caller_offset.shape[0]
            cx = self.gatIntra.message_passing(caller_x, caller_ei, caller_ea, caller_nid)
            for _ in range(2):
                cx = self.gatInter.message_passing(cx, caller_ei, caller_ea, caller_nid)
                caller_inter_x = global_mean_pool(cx, caller_nid, num_caller_intervals)
                caller_inter_x = self.gatInter.message_passing(
                    caller_inter_x, caller_iei, caller_iea, caller_inid)
                cx = self.gatLower(cx, caller_inter_x[caller_nid])
            caller_inter_x = global_mean_pool(caller_inter_x, caller_inid, num_caller_graphs)
        else:
            caller_inter_x = jnp.zeros((0, 16), jnp.float32)

        caller_entry_ids = jnp.asarray(target_entry_node, jnp.int32)[
            jnp.asarray(caller_offset, jnp.int32)]

        # ---- callee processing ----
        process_callee_flag = callee_x.shape[0] > 0
        if process_callee_flag:
            num_callee_intervals = callee_inid.shape[0]
            ex = self.gatIntra.message_passing(callee_x, callee_ei, callee_ea, callee_nid)
            for _ in range(2):
                ex = self.gatInter.message_passing(ex, callee_ei, callee_ea, callee_nid)
                callee_inter_x = global_mean_pool(ex, callee_nid, num_callee_intervals)
                callee_inter_x = self.gatInter.message_passing(
                    callee_inter_x, callee_iei, callee_iea, callee_inid)
                ex = self.gatLower(ex, callee_inter_x[callee_nid])
            callee_inter_x = global_mean_pool(callee_inter_x, callee_inid, num_callee_graphs)
        else:
            callee_inter_x = jnp.zeros((0, 16), jnp.float32)

        # ---- target processing ----
        num_target_intervals = target_inid.shape[0]
        target_msg = self.gatIntra.message_passing(target_x, target_ei, target_ea, target_nid)
        target_inter_x = None
        for _ in range(2):
            tx = self.gatInter.message_passing(target_msg, target_ei, target_ea, target_nid)
            target_inter_x = global_mean_pool(tx, target_nid, num_target_intervals)
            target_inter_x = self.gatInter.message_passing(
                target_inter_x, target_iei, target_iea, target_inid)
            tx = self.gatLower(tx, target_inter_x[target_nid])

            if process_caller_flag:
                entry_node_x_per_caller = tx[caller_entry_ids]
                caller_msg = self.gatCaller(caller_inter_x, entry_node_x_per_caller)
                caller_msg = global_mean_pool(caller_msg, caller_offset, num_target_graphs)
                entry_node_x = tx[jnp.asarray(target_entry_node, jnp.int32)]
                # masked_fill(~caller_empty_mask, 0): zero entries whose target HAS a caller
                entry_node_x_without_caller = jnp.where(~caller_empty_mask, 0.0, entry_node_x)
                # masked_fill(caller_empty_mask, 0): zero entries whose target has NO caller
                entry_node_x_with_caller = jnp.where(caller_empty_mask, 0.0, entry_node_x)
                caller_msg = caller_msg + entry_node_x_without_caller
                caller_masked_msg = global_mean_pool(caller_msg, target_entry_node,
                                                     target_nodes_num)
                entry_node_x_with_caller = global_mean_pool(entry_node_x_with_caller,
                                                            target_entry_node,
                                                            target_nodes_num)
                target_msg = tx - 0.5 * entry_node_x_with_caller + 0.5 * caller_masked_msg
            else:
                target_msg = tx

            if process_callee_flag and num_callee_graphs > 0:
                # One fused launch: per-callee MLP, mask-select vs target_msg,
                # and the mean over callees accumulated in the output block.
                target_msg = self.gatCalleeCombine(callee_inter_x, target_msg, callee_mask)

        target_inter_x = global_mean_pool(target_inter_x, target_inid, num_target_graphs)
        return self.gatInter.fc(target_inter_x)


# ----------------------------- example run ---------------------------------

if __name__ == "__main__":
    key = jax.random.PRNGKey(0)
    kp, kd = jax.random.split(key)
    in_channels, hidden_channels, out_channels, heads = 8, 32, 4, 2
    model = EGINN(kp, in_channels, hidden_channels, out_channels, heads)

    dks = jax.random.split(kd, 12)

    # caller: 6 nodes, 3 intervals, 2 graphs
    caller_x = jax.random.normal(dks[0], (6, in_channels), jnp.float32)
    caller_ei = jnp.array([[0, 1, 2, 3, 4], [1, 2, 3, 4, 5]], jnp.int32)
    caller_ea = jax.random.normal(dks[1], (5, EDGE_DIM), jnp.float32)
    caller_nid = jnp.array([0, 0, 1, 1, 2, 2], jnp.int32)
    caller_iei = jnp.array([[0, 1], [1, 2]], jnp.int32)
    caller_iea = jax.random.normal(dks[2], (2, EDGE_DIM), jnp.float32)
    caller_inid = jnp.array([0, 0, 1], jnp.int32)

    # target: 10 nodes, 4 intervals, 2 graphs
    target_x = jax.random.normal(dks[3], (10, in_channels), jnp.float32)
    target_ei = jnp.array([[0, 1, 2, 3, 5, 6, 7, 8], [1, 2, 3, 4, 6, 7, 8, 9]], jnp.int32)
    target_ea = jax.random.normal(dks[4], (8, EDGE_DIM), jnp.float32)
    target_nid = jnp.array([0, 0, 0, 1, 1, 2, 2, 2, 3, 3], jnp.int32)
    target_iei = jnp.array([[0, 2], [1, 3]], jnp.int32)
    target_iea = jax.random.normal(dks[5], (2, EDGE_DIM), jnp.float32)
    target_inid = jnp.array([0, 0, 1, 1], jnp.int32)

    # callee: 6 nodes, 2 intervals, 2 graphs
    callee_x = jax.random.normal(dks[6], (6, in_channels), jnp.float32)
    callee_ei = jnp.array([[0, 1, 3, 4], [1, 2, 4, 5]], jnp.int32)
    callee_ea = jax.random.normal(dks[7], (4, EDGE_DIM), jnp.float32)
    callee_nid = jnp.array([0, 0, 0, 1, 1, 1], jnp.int32)
    callee_iei = jnp.array([[0], [1]], jnp.int32)
    callee_iea = jax.random.normal(dks[8], (1, EDGE_DIM), jnp.float32)
    callee_inid = jnp.array([0, 1], jnp.int32)

    caller_offset = jnp.array([0, 1], jnp.int32)      # caller graph -> target graph
    target_offset = jnp.array([0, 1], jnp.int32)      # target graph -> first callee graph id
    target_entry_node = jnp.array([0, 5], jnp.int32)  # entry node per target graph
    caller_empty_mask = jnp.array([[True], [False]])

    # target_calling_mask[t][i] = list of (local) callee ids node i of target t calls
    target_calling_mask = [
        [[0], [], [0], [], []],   # target graph 0 (nodes 0..4)
        [[0], [], [], [], [0]],   # target graph 1 (nodes 5..9)
    ]
    caller_calling_mask = [[], []]  # unused by the forward pass

    # host-side precompute (once per batch), kept off forward's critical path
    num_callee_graphs = int(np.max(np.asarray(callee_inid))) + 1
    callee_mask = build_callee_mask(target_calling_mask, np.asarray(target_offset),
                                    target_x.shape[0], num_callee_graphs)

    out = model.forward(
        (caller_x, target_x, callee_x),
        (caller_ei, target_ei, callee_ei),
        (caller_ea, target_ea, callee_ea),
        (caller_iei, target_iei, callee_iei),
        (caller_iea, target_iea, callee_iea),
        (caller_nid, target_nid, callee_nid),
        (caller_inid, target_inid, callee_inid),
        (caller_offset, target_offset),
        target_entry_node,
        (caller_calling_mask, target_calling_mask),
        caller_empty_mask,
        callee_mask=callee_mask,
    )
    out = jax.block_until_ready(out)
    assert out.shape == (2, out_channels) and bool(jnp.all(jnp.isfinite(out)))
    print("KERNEL_OK")
</pallas_src>

<mosaic_0001>
module attributes {stable_mosaic.version = 11 : i64} {
  func.func @_gat_attn_kernel(%arg0: i32, %arg1: memref<6x8xf32, #tpu.memory_space<vmem>>, %arg2: memref<8x6xf32, #tpu.memory_space<vmem>>, %arg3: memref<6x8xf32, #tpu.memory_space<vmem>>, %arg4: memref<8x16xf32, #tpu.memory_space<vmem>>, %arg5: memref<1x16xf32, #tpu.memory_space<vmem>>, %arg6: memref<2x8xf32, #tpu.memory_space<vmem>>, %arg7: memref<1x2xf32, #tpu.memory_space<vmem>>, %arg8: memref<6x6xf32, #tpu.memory_space<vmem>>, %arg9: memref<6x16xf32, #tpu.memory_space<vmem>>, %arg10: memref<6x16xf32, #tpu.memory_space<vmem>>) attributes {dimension_semantics = [#tpu.dimension_semantics<arbitrary>], iteration_bounds = array<i64: 1>, scalar_prefetch = 0 : i64, scratch_operands = 1 : i64, tpu.core_type = #tpu.core_type<tc>, window_params = [{pipeline_mode = #tpu.pipeline_mode<synchronous>, transform_indices = @transform_0, window_bounds = array<i64: 6, 8>}, {pipeline_mode = #tpu.pipeline_mode<synchronous>, transform_indices = @transform_1, window_bounds = array<i64: 8, 6>}, {transform_indices = @transform_2, window_bounds = array<i64: 6, 8>}, {pipeline_mode = #tpu.pipeline_mode<synchronous>, transform_indices = @transform_3, window_bounds = array<i64: 8, 16>}, {pipeline_mode = #tpu.pipeline_mode<synchronous>, transform_indices = @transform_4, window_bounds = array<i64: 1, 16>}, {pipeline_mode = #tpu.pipeline_mode<synchronous>, transform_indices = @transform_5, window_bounds = array<i64: 2, 8>}, {pipeline_mode = #tpu.pipeline_mode<synchronous>, transform_indices = @transform_6, window_bounds = array<i64: 1, 2>}, {transform_indices = @transform_7, window_bounds = array<i64: 6, 6>}, {transform_indices = @transform_8, window_bounds = array<i64: 6, 16>}]} {
    %c0_i32 = arith.constant 0 : i32
    %0 = arith.cmpi eq, %arg0, %c0_i32 : i32
    %1 = arith.extui %0 : i1 to i32
    %c0_i32_0 = arith.constant 0 : i32
    %2 = arith.cmpi ne, %1, %c0_i32_0 : i32
    scf.if %2 {
      %c0_23 = arith.constant 0 : index
      %c0_24 = arith.constant 0 : index
      %40 = vector.load %arg1[%c0_23, %c0_24] : memref<6x8xf32, #tpu.memory_space<vmem>>, vector<6x8xf32>
      %c0_25 = arith.constant 0 : index
      %c0_26 = arith.constant 0 : index
      %41 = vector.load %arg4[%c0_25, %c0_26] : memref<8x16xf32, #tpu.memory_space<vmem>>, vector<8x16xf32>
      %cst_27 = arith.constant dense<0.000000e+00> : vector<6x16xf32>
      %42 = tpu.matmul %40, %41, %cst_27 {dimension_numbers = #tpu.dot_dimension_numbers<[1], [0], [0], [1], [0, 0, 1, 1], [], []>} : vector<6x8xf32>, vector<8x16xf32>, vector<6x16xf32> -> vector<6x16xf32>
      %c0_28 = arith.constant 0 : index
      %c0_29 = arith.constant 0 : index
      %43 = vector.load %arg5[%c0_28, %c0_29] : memref<1x16xf32, #tpu.memory_space<vmem>>, vector<1x16xf32>
      %44 = vector.broadcast %43 : vector<1x16xf32> to vector<6x16xf32>
      %45 = arith.addf %42, %44 : vector<6x16xf32>
      %c0_30 = arith.constant 0 : index
      %c0_31 = arith.constant 0 : index
      %46 = vector.load %arg10[%c0_30, %c0_31] : memref<6x16xf32, #tpu.memory_space<vmem>>, vector<6x16xf32>
      tpu.vector_store %arg10[%c0_30, %c0_31], %45 {strides = array<i32>} : memref<6x16xf32, #tpu.memory_space<vmem>>, vector<6x16xf32>,
    } else {
    }
    %c0 = arith.constant 0 : index
    %c0_1 = arith.constant 0 : index
    %3 = vector.load %arg6[%c0, %c0_1] : memref<2x8xf32, #tpu.memory_space<vmem>>, vector<1x8xf32>
    %c0_2 = arith.constant 0 : index
    %c0_3 = arith.constant 0 : index
    %4 = vector.load %arg2[%c0_2, %c0_3] : memref<8x6xf32, #tpu.memory_space<vmem>>, vector<8x6xf32>
    %cst = arith.constant dense<0.000000e+00> : vector<1x6xf32>
    %5 = tpu.matmul %3, %4, %cst {dimension_numbers = #tpu.dot_dimension_numbers<[1], [0], [0], [1], [0, 0, 1, 1], [], []>} : vector<1x8xf32>, vector<8x6xf32>, vector<1x6xf32> -> vector<1x6xf32>
    %c0_4 = arith.constant 0 : index
    %c0_5 = arith.constant 0 : index
    %6 = vector.load %arg7[%c0_4, %c0_5] : memref<1x2xf32, #tpu.memory_space<vmem>>, vector<1x1xf32>
    %7 = vector.broadcast %6 : vector<1x1xf32> to vector<1x6xf32>
    %8 = arith.addf %5, %7 : vector<1x6xf32>
    %c0_6 = arith.constant 0 : index
    %c0_7 = arith.constant 0 : index
    %9 = vector.load %arg3[%c0_6, %c0_7] : memref<6x8xf32, #tpu.memory_space<vmem>>, vector<6x8xf32>
    %c1 = arith.constant 1 : index
    %c0_8 = arith.constant 0 : index
    %10 = vector.load %arg6[%c1, %c0_8] : memref<2x8xf32, #tpu.memory_space<vmem>>, vector<1x8xf32>
    %11 = vector.broadcast %10 : vector<1x8xf32> to vector<6x8xf32>
    %12 = arith.mulf %9, %11 : vector<6x8xf32>
    %cst_9 = arith.constant dense<0.000000e+00> : vector<6xf32>
    %13 = vector.multi_reduction <add>, %12, %cst_9 [1] : vector<6x8xf32> to vector<6xf32>
    %14 = vector.shape_cast %13 : vector<6xf32> to vector<6x1xf32>
    %c0_10 = arith.constant 0 : index
    %c1_11 = arith.constant 1 : index
    %15 = vector.load %arg7[%c0_10, %c1_11] : memref<1x2xf32, #tpu.memory_space<vmem>>, vector<1x1xf32>
    %16 = vector.broadcast %15 : vector<1x1xf32> to vector<6x1xf32>
    %17 = arith.addf %14, %16 : vector<6x1xf32>
    %c0_12 = arith.constant 0 : index
    %c0_13 = arith.constant 0 : index
    %18 = vector.load %arg8[%c0_12, %c0_13] : memref<6x6xf32, #tpu.memory_space<vmem>>, vector<6x6xf32>
    %19 = vector.broadcast %17 : vector<6x1xf32> to vector<6x6xf32>
    %20 = arith.addf %18, %19 : vector<6x6xf32>
    %21 = vector.broadcast %8 : vector<1x6xf32> to vector<6x6xf32>
    %22 = arith.addf %20, %21 : vector<6x6xf32>
    %cst_14 = arith.constant 0.000000e+00 : f32
    %23 = vector.broadcast %cst_14 : f32 to vector<6x6xf32>
    %24 = arith.cmpf ogt, %22, %23 : vector<6x6xf32>
    %cst_15 = arith.constant 2.000000e-01 : f32
    %25 = vector.broadcast %cst_15 : f32 to vector<6x6xf32>
    %26 = arith.mulf %25, %22 : vector<6x6xf32>
    %27 = arith.select %24, %22, %26 : vector<6x6xi1>, vector<6x6xf32>
    %cst_16 = arith.constant dense<0xFF800000> : vector<6xf32>
    %28 = vector.multi_reduction <maximumf>, %27, %cst_16 [1] : vector<6x6xf32> to vector<6xf32>
    %29 = vector.shape_cast %28 : vector<6xf32> to vector<6x1xf32>
    %30 = vector.broadcast %29 : vector<6x1xf32> to vector<6x6xf32>
    %31 = arith.subf %27, %30 : vector<6x6xf32>
    %32 = math.exp %31 : vector<6x6xf32>
    %cst_17 = arith.constant dense<0.000000e+00> : vector<6xf32>
    %33 = vector.multi_reduction <add>, %32, %cst_17 [1] : vector<6x6xf32> to vector<6xf32>
    %34 = vector.shape_cast %33 : vector<6xf32> to vector<6x1xf32>
    %35 = vector.broadcast %34 : vector<6x1xf32> to vector<6x6xf32>
    %36 = arith.divf %32, %35 : vector<6x6xf32>
    %c0_18 = arith.constant 0 : index
    %c0_19 = arith.constant 0 : index
    %37 = vector.load %arg10[%c0_18, %c0_19] : memref<6x16xf32, #tpu.memory_space<vmem>>, vector<6x16xf32>
    %cst_20 = arith.constant dense<0.000000e+00> : vector<6x16xf32>
    %38 = tpu.matmul %36, %37, %cst_20 {dimension_numbers = #tpu.dot_dimension_numbers<[1], [0], [0], [1], [0, 0, 1, 1], [], []>} : vector<6x6xf32>, vector<6x16xf32>, vector<6x16xf32> -> vector<6x16xf32>
    %c0_21 = arith.constant 0 : index
    %c0_22 = arith.constant 0 : index
    %39 = vector.load %arg9[%c0_21, %c0_22] : memref<6x16xf32, #tpu.memory_space<vmem>>, vector<6x16xf32>
    tpu.vector_store %arg9[%c0_21, %c0_22], %38 {strides = array<i32>} : memref<6x16xf32, #tpu.memory_space<vmem>>, vector<6x16xf32>,
    return
  }
  func.func @transform_0(%arg0: i32) -> (i32, i32) {
    %c0_i32 = arith.constant 0 : i32
    %c0_i32_0 = arith.constant 0 : i32
    %c0_i32_1 = arith.constant 0 : i32
    return %c0_i32, %c0_i32_0 : i32, i32
  }
  func.func @transform_1(%arg0: i32) -> (i32, i32) {
    %c0_i32 = arith.constant 0 : i32
    %c0_i32_0 = arith.constant 0 : i32
    %c0_i32_1 = arith.constant 0 : i32
    return %c0_i32, %c0_i32_0 : i32, i32
  }
  func.func @transform_2(%arg0: i32) -> (i32, i32) {
    %c0_i32 = arith.constant 0 : i32
    %c0_i32_0 = arith.constant 0 : i32
    return %arg0, %c0_i32 : i32, i32
  }
  func.func @transform_3(%arg0: i32) -> (i32, i32) {
    %c0_i32 = arith.constant 0 : i32
    %c0_i32_0 = arith.constant 0 : i32
    %c0_i32_1 = arith.constant 0 : i32
    return %c0_i32, %c0_i32_0 : i32, i32
  }
  func.func @transform_4(%arg0: i32) -> (i32, i32) {
    %c0_i32 = arith.constant 0 : i32
    %c0_i32_0 = arith.constant 0 : i32
    %c0_i32_1 = arith.constant 0 : i32
    return %c0_i32, %c0_i32_0 : i32, i32
  }
  func.func @transform_5(%arg0: i32) -> (i32, i32) {
    %c0_i32 = arith.constant 0 : i32
    %c0_i32_0 = arith.constant 0 : i32
    %c0_i32_1 = arith.constant 0 : i32
    return %c0_i32, %c0_i32_0 : i32, i32
  }
  func.func @transform_6(%arg0: i32) -> (i32, i32) {
    %c0_i32 = arith.constant 0 : i32
    %c0_i32_0 = arith.constant 0 : i32
    %c0_i32_1 = arith.constant 0 : i32
    return %c0_i32, %c0_i32_0 : i32, i32
  }
  func.func @transform_7(%arg0: i32) -> (i32, i32) {
    %c0_i32 = arith.constant 0 : i32
    %c0_i32_0 = arith.constant 0 : i32
    return %arg0, %c0_i32 : i32, i32
  }
  func.func @transform_8(%arg0: i32) -> (i32, i32) {
    %c0_i32 = arith.constant 0 : i32
    %c0_i32_0 = arith.constant 0 : i32
    return %arg0, %c0_i32 : i32, i32
  }
}

</mosaic_0001>

<bundles_post_ra>
// kernel: tpu_custom_call.1
= control target key start
LH: loop header
LB: loop body
LE: loop exit
PB: predicated region body
PF: predicated region fallthrough
CT: control target
= control target key end

     0   :  { %13 = vsyncpa [#allocation4], 0  ;;  %s691_s0 = inlined_call_operand.hbm [shape: f32[6,8], index: 0, kind: input, shape index: {}]   ;;  %s692_s1 = inlined_call_operand.hbm [shape: f32[8,6], index: 1, kind: input, shape index: {}]   ;;  %s693_s2 = inlined_call_operand.hbm [shape: f32[6,8], index: 2, kind: input, shape index: {}]   ;;  %s694_s3 = inlined_call_operand.vmem [shape: f32[8,16], index: 3, kind: input, shape index: {}]   ;;  %s695_s4 = inlined_call_operand.hbm [shape: f32[1,16], index: 4, kind: input, shape index: {}]   ;;  %s696_s5 = inlined_call_operand.vmem [shape: f32[2,8], index: 5, kind: input, shape index: {}]   ;;  %s697_s6 = inlined_call_operand.vmem [shape: f32[1,2], index: 6, kind: input, shape index: {}]   ;;  %s698_s7 = inlined_call_operand.vmem [shape: f32[6,6], index: 7, kind: input, shape index: {}]   ;;  %s699_s8 = inlined_call_operand.hbm [shape: f32[6,16], index: 8, kind: output, shape index: {}]  }
   0x1   :  { %14 = vsyncpa [#allocation7], 0 }
   0x2   :  { %15 = vsyncpa [#allocation10], 0 }
   0x3   :  { %16 = vsyncpa [#allocation5], 0  ;;  %s555_s27 = smov [#allocation6]   ;;  %s556_s29 = smov [#allocation3]  }
   0x4   :  { %s33_s28 = sshll.u32 %s555_s27, 4  ;;  %s23_s30 = sshll.u32 %s556_s29, 4  ;;  %s34_s28 = int_to_ptr.vmem [resolvable:$true] %s33_s28  ;;  %s24_s30 = int_to_ptr.vmem [resolvable:$true] %s23_s30 }
   0x5   :  { %s437_s11 = scalar_lea.hbm %s692_s1, 128 }
   0x6   :  { %p438_p0 = scmp.ne.s32.totalorder %s692_s1, %s437_s11  ;;  %p441_p1 = scmp.lt.u32.totalorder %s437_s11, %s692_s1 }
   0x8   :  { %p443_p2 = pnand %p441_p1, %p438_p0 }
   0xa   :  { %446 = shalt.err (!%p443_p2)
}
   0xb   :  { %s447_s16 = scalar_lea.vmem %s34_s28, 128  ;;  %p452_p4 = scmp.lt.s32.totalorder %s34_s28, %s34_s28 }
   0xc   :  { %p448_p3 = scmp.ne.s32.totalorder %s34_s28, %s447_s16  ;;  %p453_p5 = scmp.lt.s32.totalorder %s447_s16, %s447_s16 }
   0xe   :  { %p454_p6 = por %p453_p5, %p452_p4 }
  0x10   :  { %p455_p7 = pnand %p454_p6, %p448_p3 }
  0x12   :  { %458 = shalt.err (!%p455_p7)
}
  0x13   :  { %36 = dma.hbm_to_vmem [thread:$0]  %s692_s1, 128, %s34_s28, [#allocation7]  }
  0x14   :  { %s459_s21 = scalar_lea.hbm %s691_s0, 128 }
  0x15   :  { %p460_p8 = scmp.ne.s32.totalorder %s691_s0, %s459_s21  ;;  %p463_p9 = scmp.lt.u32.totalorder %s459_s21, %s691_s0 }
  0x17   :  { %p465_p10 = pnand %p463_p9, %p460_p8 }
  0x19   :  { %468 = shalt.err (!%p465_p10)
}
  0x1a   :  { %s469_s26 = scalar_lea.vmem %s24_s30, 128  ;;  %p474_p12 = scmp.lt.s32.totalorder %s24_s30, %s24_s30 }
  0x1b   :  { %p470_p11 = scmp.ne.s32.totalorder %s24_s30, %s469_s26  ;;  %p475_p13 = scmp.lt.s32.totalorder %s469_s26, %s469_s26 }
  0x1d   :  { %p476_p0 = por %p475_p13, %p474_p12 }
  0x1f   :  { %p477_p1 = pnand %p476_p0, %p470_p11 }
  0x21   :  { %480 = shalt.err (!%p477_p1)
}
  0x22   :  { %26 = dma.hbm_to_vmem [thread:$0]  %s691_s0, 128, %s24_s30, [#allocation4]  }
  0x23   :  { %s557_s28 = smov [#allocation8]   ;;  %s558_s9 = smov [#allocation9]  }
  0x24   :  { %s43_s29 = sshll.u32 %s557_s28, 4  ;;  %s55_s10 = sshll.u32 %s558_s9, 4  ;;  %s44_s29 = int_to_ptr.vmem [resolvable:$true] %s43_s29  ;;  %s56_s10 = int_to_ptr.vmem [resolvable:$true] %s55_s10 }
  0x25   :  { %s481_s13 = scalar_lea.hbm %s693_s2, 128 }
  0x26   :  { %p482_p2 = scmp.ne.s32.totalorder %s693_s2, %s481_s13  ;;  %p485_p3 = scmp.lt.u32.totalorder %s481_s13, %s693_s2 }
  0x28   :  { %p487_p4 = pnand %p485_p3, %p482_p2 }
  0x2a   :  { %490 = shalt.err (!%p487_p4)
}
  0x2b   :  { %s491_s0 = scalar_lea.vmem %s44_s29, 128  ;;  %p496_p6 = scmp.lt.s32.totalorder %s44_s29, %s44_s29 }
  0x2c   :  { %p492_p5 = scmp.ne.s32.totalorder %s44_s29, %s491_s0  ;;  %p497_p7 = scmp.lt.s32.totalorder %s491_s0, %s491_s0 }
  0x2e   :  { %p498_p8 = por %p497_p7, %p496_p6 }
  0x30   :  { %p499_p9 = pnand %p498_p8, %p492_p5 }
  0x32   :  { %502 = shalt.err (!%p499_p9)
}
  0x33   :  { %46 = dma.hbm_to_vmem [thread:$0]  %s693_s2, 128, %s44_s29, [#allocation7]  }
  0x34   :  { %s503_s21 = scalar_lea.hbm %s695_s4, 16 }
  0x35   :  { %p504_p10 = scmp.ne.s32.totalorder %s695_s4, %s503_s21  ;;  %p507_p11 = scmp.lt.u32.totalorder %s503_s21, %s695_s4 }
  0x37   :  { %p509_p12 = pnand %p507_p11, %p504_p10 }
  0x39   :  { %512 = shalt.err (!%p509_p12)
}
  0x3a   :  { %s513_s26 = scalar_lea.vmem %s56_s10, 16  ;;  %s517_s1 = scalar_lea.vmem %s56_s10, 32 }
  0x3b   :  { %p514_p13 = scmp.ne.s32.totalorder %s56_s10, %s513_s26  ;;  %p518_p0 = scmp.lt.s32.totalorder %s56_s10, %s56_s10 }
  0x3c   :  { %p519_p1 = scmp.lt.s32.totalorder %s517_s1, %s513_s26 }
  0x3e   :  { %p520_p2 = por %p519_p1, %p518_p0 }
  0x40   :  { %p521_p3 = pnand %p520_p2, %p514_p13 }
  0x42   :  { %524 = shalt.err (!%p521_p3)
}
  0x43   :  { %58 = dma.hbm_to_vmem [thread:$0]  %s695_s4, 16, %s56_s10, [#allocation10]  }
  0x44   :  { %547 = dma.done.wait [#allocation4], 128  }
  0x45   :  { %548 = vsyncadd [#allocation4], 4294967168 }
  0x46   :  { %549 = dma.done.wait [#allocation7], 256  }
  0x47   :  { %550 = vsyncadd [#allocation7], 4294967040 }
  0x48   :  { %551 = dma.done.wait [#allocation10], 16  }
  0x49   :  { %552 = vsyncadd [#allocation10], 4294967280  ;;  %v559_v0 = vmov 0.0   ;;  %vm560_vm0 = vmmov 0   ;;  %v561_v1 = vmov 0   ;;  %vm90_vm1 = vcmask 64512  }
  0x4a   :  { %411 = vmatprep.subr.mxu1 %v559_v0  ;;  %413 = vmatprep.mubr.msk.f32.mxu1 %vm560_vm0, %v559_v0  ;;  %v252_v2 = vld [vmem:[#allocation8] sm:$0x3f]  ;;  %v397_v3 = vld [vmem:[%s696_s5 + $0x1] ss:$0 sm:$0xff]  ;;  %vm259_vm2 = vcmask 62464   ;;  %v167_v4 = vld [vmem:[#allocation6] sm:$0xff]  ;;  %v174_v10 = vlaneseq }
  0x4b   :  { %430 = vset.pattern.permute.xlu0 %v561_v1  ;;  %406 = vmatprep.subr.mxu0 %v559_v0  ;;  %v258_v5 = vmul.f32 %v397_v3, %v252_v2  ;;  %v166_v6 = vld [vmem:[%s696_s5] sm:$0x1]  ;;  %v562_v8 = vmov 1   ;;  %v81_v17 = vld [vmem:[#allocation3] sm:$0x3f]  ;;  %vm284_vm4 = vcmask 46080  }
  0x4c   :  { %408 = vmatprep.mubr.msk.f32.mxu0 %vm560_vm0, %v559_v0  ;;  %412 = vmatpush3.msra.mxu1 %v167_v4  ;;  %v168_v9 = vld [vmem:[%s697_s6] sm:$0x1]  ;;  %v175_v11 = vshrl.u32 %v174_v10, 7  ;;  %vm164_vm5 = vcmask 128000   ;;  %vm301_vm6 = vcmask 1045504   ;;  %vm297_vm7 = vcmask 48128  }
  0x4d   :  { %414 = vmatmul.mubr.msk.f32.vlgmr.msra.gmra.mrb[0].mxu1 %vm90_vm1, %v166_v6  ;;  %v260_v7 = vsel %vm259_vm2, %v258_v5, 0.0  ;;  %431 = vset.pattern.permute.xlu1 %v562_v8  ;;  %v82_v16 = vld [vmem:[%s694_s3] sm:$0xff]  ;;  %s563_s3 = smov [#allocation11]  }
  0x4e   :  { %261 = vadd.xlane.f32.xlu0 %v260_v7  ;;  %v176_v12 = vsub.s32 0, %v175_v11  ;;  %407 = vmatpush3.msra.mxu0 %v82_v16  ;;  %v269_v23 = vld [vmem:[%s698_s7] sm:$0x3f]  ;;  %s383_s7 = sshll.u32 %s563_s3, 4  ;;  %s384_s7 = int_to_ptr.vmem [resolvable:$true] %s383_s7 }
  0x4f   :  { %409 = vmatmul.mubr.msk.f32.vlgmr.msra.gmra.mrb[0].mxu0 %vm90_vm1, %v81_v17  ;;  %416 = vmatprep.subr.mxu0 %v559_v0  ;;  %v394_v31 = vld [vmem:[#allocation9] ss:$0 sm:$0xff]  ;;  %s525_s14 = scalar_lea.vmem %s384_s7, 128  ;;  %p530_p5 = scmp.lt.s32.totalorder %s384_s7, %s384_s7 }
  0x50   :  { %v266_v13 = vrot.slane %v168_v9, %v176_v12  ;;  %418 = vmatprep.mubr.msk.f32.mxu0 %vm560_vm0, %v559_v0  ;;  %p526_p4 = scmp.ne.s32.totalorder %s384_s7, %s525_s14  ;;  %p531_p6 = scmp.lt.s32.totalorder %s525_s14, %s525_s14 }
  0x52   :  { %p532_p7 = por %p531_p6, %p530_p5 }
  0x54   :  { %p533_p8 = pnand %p532_p7, %p526_p4 }
  0x64   :  { %171 = vperm.xlu0 %430, %v168_v9  }
  0x68   :  { %432 = vset.pattern.permute.xlu0 %v562_v8 }
  0xdb   :  { %v262_v14 = vpop.xlane.xlu0 %261 }
  0xdc   :  { %v268_v15 = vadd.f32 %v266_v13, %v262_v14 }
  0xde   :  { %272 = vperm.xlu1 %431, %v268_v15  }
  0xe3   :  { %v172_v20 = vpop.permute.xlu0 %171 }
  0xe4   :  { %v177_v21 = vrot.slane %v172_v20, %v176_v12 }
 0x120   :  { %v248_v18 = vpop.f32.mrb[0].mxu1 }
 0x121   :  { %v415_v19 = vpop.f32.mrb[1].mxu1  ;;  %v249_v22 = vadd.f32 %v248_v18, %v177_v21 }
 0x122   :  { %v160_v32 = vpop.f32.mrb[0].mxu0 }
 0x123   :  { %v279_v24 = vrot.slane %v249_v22, %v176_v12  ;;  %v161_v33 = vadd.f32 %v394_v31, %v160_v32  ;;  %v410_v34 = vpop.f32.mrb[1].mxu0 }
 0x125   :  { %165 = vst.msk [vmem:[#allocation2] sm:$0x3f] %vm164_vm5, %v161_v33 }
 0x12c   :  { %v296_v40 = vld [vmem:[#allocation2] sm:$0x3f] }
 0x12d   :  { %417 = vmatpush3.msk.msra.mxu0 %vm301_vm6, %v296_v40 }
 0x15d   :  { %v273_v25 = vpop.permute.xlu1 %272 }
 0x15e   :  { %v275_v26 = vadd.f32 %v273_v25, %v269_v23 }
 0x160   :  { %v280_v27 = vadd.f32 %v279_v24, %v275_v26 }
 0x162   :  { %vm281_vm3 = vcmp.gt.f32.partialorder %v280_v27, 0.0  ;;  %v282_v28 = vmul.f32 0.2, %v280_v27 }
 0x164   :  { %v283_v29 = vsel %vm281_vm3, %v280_v27, %v282_v28 }
 0x165   :  { %v285_v30 = vsel %vm284_vm4, %v283_v29, -inf }
 0x166   :  { %286 = vmax.xlane.f32.xlu1 %v285_v30 }
 0x1f3   :  { %v287_v35 = vpop.xlane.xlu1 %286 }
 0x1f4   :  { %v288_v36 = vsub.f32 %v283_v29, %v287_v35 }
 0x1f6   :  { %v289_v37 = vmul.f32 1.442695, %v288_v36 }
 0x1f8   :  { %433 = vpow2.f32 %v289_v37 }
 0x202   :  { %v434_v38 = vpop.eup %433 }
 0x203   :  { %v291_v39 = vsel %vm284_vm4, %v434_v38, 0.0 }
 0x204   :  { %292 = vadd.xlane.f32.xlu1 %v291_v39 }
 0x291   :  { %v293_v41 = vpop.xlane.xlu1 %292 }
 0x292   :  { %435 = vrcp.f32 %v293_v41 }
 0x29c   :  { %v436_v42 = vpop.eup %435 }
 0x29d   :  { %v295_v43 = vmul.f32 %v436_v42, %v434_v38 }
 0x29f   :  { %419 = vmatmul.mubr.msk.f32.vlgmr.msra.gmra.mrb[2].mxu0 %vm297_vm7, %v295_v43 }
 0x372   :  { %v371_v44 = vpop.f32.mrb[2].mxu0 }
 0x373   :  { %376 = vst.msk [vmem:[#allocation11] sm:$0x3f] %vm164_vm5, %v371_v44  ;;  %v420_v45 = vpop.f32.mrb[3].mxu0 }
 0x374   :  { %536 = shalt.err (!%p533_p8)
}
 0x375   :  { %s537_s17 = scalar_lea.hbm %s699_s8, 128 }
 0x376   :  { %p538_p9 = scmp.ne.s32.totalorder %s699_s8, %s537_s17  ;;  %p541_p10 = scmp.lt.u32.totalorder %s537_s17, %s699_s8 }
 0x378   :  { %p543_p11 = pnand %p541_p10, %p538_p9 }
 0x37a   :  { %546 = shalt.err (!%p543_p11)
}
 0x37b   :  { %386 = dma.vmem_to_hbm [thread:$0]  %s384_s7, 128, %s699_s8, [#allocation5]  }
 0x37c   :  { %553 = dma.done.wait [#allocation5], 128  }
 0x37d   :  { %554 = vsyncadd [#allocation5], 4294967168 }
 0x37e   :  { %390 = vsyncpa [#allocation4], 1 }
 0x37f   :  { %391 = vsyncpa [#allocation7], 1 }
 0x380   :  { %392 = vsyncpa [#allocation10], 1 }
 0x381   :  { %393 = vsyncpa [#allocation5], 1 }

</bundles_post_ra>
